<compile_context>
chip_gen: v7x
topology: tpu7x:2x2x1
jax: 0.10.0
libtpu: 0.0.40
codegen_flags: <defaults>
</compile_context>

<pallas_src>
import numpy as np
import jax
import jax.numpy as jnp
from jax import lax
from jax.experimental import pallas as pl
from jax.experimental.pallas import tpu as pltpu


def _round_up(x, m):
    return ((x + m - 1) // m) * m


# ----------------------------------------------------------------------------
# Pallas kernel: Tc GRU timesteps per grid iteration. Hidden state carried in
# a VMEM scratch buffer across the sequential ("arbitrary") time-chunk axis.
#
#   xproj_ref : (Tc, Bp, 3*Hp)  precomputed x@Wx + (b_ir+b_hr | b_iz+b_hz | b_in)
#   lens_ref  : (Bp, 1) int32   sequence lengths (0 for padded batch rows)
#   h0_ref    : (Bp, Hp)        initial hidden state
#   wh_ref    : (Hp, 3*Hp)      fused recurrent weight [Whr | Whz | Whn]
#   bhn_ref   : (1, Hp)         b_hn (must stay separate: gated by r)
#   out_ref   : (Tc, Bp, Hp)    per-step outputs (zeros past lens)
#   hN_ref    : (Bp, Hp)        final hidden state
# ----------------------------------------------------------------------------
def _gru_chunk_kernel(xproj_ref, lens_ref, h0_ref, wh_ref, bhn_ref,
                      out_ref, hN_ref, h_scratch):
    chunk = pl.program_id(0)
    n_chunks = pl.num_programs(0)

    Tc = xproj_ref.shape[0]
    Bp, Hp = hN_ref.shape

    @pl.when(chunk == 0)
    def _():
        h_scratch[...] = h0_ref[...]

    # Hoist everything loop-invariant out of the unrolled inner loop.
    wh = wh_ref[...]                                    # (Hp, 3Hp), VMEM-resident
    lens_vec = lens_ref[...]                            # (Bp, 1) int32
    bhn_b = jnp.broadcast_to(bhn_ref[...], (Bp, Hp))    # hoisted broadcast
    t0 = chunk * Tc

    def step(i, h):
        # PyTorch GRU cell (input projection + input/hr/hz biases prefolded):
        #   r = sigmoid(gx_r + gh_r)
        #   z = sigmoid(gx_z + gh_z)
        #   n = tanh   (gx_n + r * (gh_n + b_hn))
        #   h = (1 - z) * n + z * h
        gx = xproj_ref[i]                               # (Bp, 3Hp)
        gh = jnp.dot(h, wh, preferred_element_type=jnp.float32)  # one MXU push
        r = jax.nn.sigmoid(gx[:, 0:Hp] + gh[:, 0:Hp])
        z = jax.nn.sigmoid(gx[:, Hp:2 * Hp] + gh[:, Hp:2 * Hp])
        n = jnp.tanh(gx[:, 2 * Hp:3 * Hp] + r * (gh[:, 2 * Hp:3 * Hp] + bhn_b))
        h_new = (1.0 - z) * n + z * h

        # packed-sequence masking: freeze state / zero output once t >= lens[b]
        valid = lens_vec > (t0 + i)                     # (Bp, 1) bool
        h_next = jnp.where(valid, h_new, h)
        out_ref[i] = jnp.where(valid, h_new, 0.0)
        return h_next

    h_final = lax.fori_loop(0, Tc, step, h_scratch[...], unroll=True)
    h_scratch[...] = h_final

    @pl.when(chunk == n_chunks - 1)
    def _():
        hN_ref[...] = h_final


# ----------------------------------------------------------------------------
# Wrapper: gate fusion + padding to (8,128), hoisted input projection, pallas_call.
# ----------------------------------------------------------------------------
def decoder_rnn_forward(x_bsf, hidden, lens, params, *, time_chunk=8):
    """x_bsf: (batch, seq, input_size) f32 (batch_first, as in the PyTorch forward);
    hidden: (1, batch, hidden) f32; lens: python/np int sequence.
    Returns (output (T, B, H) time-major, hidden (1, B, H))."""
    lens_np = np.asarray(lens, dtype=np.int32)
    B, S, I = x_bsf.shape
    H = hidden.shape[-1]
    T = int(lens_np.max())                      # pad_packed_sequence length

    Bp = _round_up(max(B, 1), 8)                # sublane-aligned batch
    Hp = _round_up(max(H, 1), 128)              # lane-aligned hidden
    Tc = max(1, int(time_chunk))
    num_chunks = -(-T // Tc)
    Tp = num_chunks * Tc

    (wxr, wxz, wxn, whr, whz, whn, br, bz, bin_, bhn) = params

    f32 = jnp.float32
    # Fused + lane-padded weights. Gate order along the 3*Hp axis: [r | z | n],
    # each gate occupying a 128-aligned Hp-wide slab.
    wx_f = jnp.zeros((I, 3 * Hp), f32)
    wx_f = wx_f.at[:, 0:H].set(wxr)
    wx_f = wx_f.at[:, Hp:Hp + H].set(wxz)
    wx_f = wx_f.at[:, 2 * Hp:2 * Hp + H].set(wxn)

    bx_f = jnp.zeros((1, 3 * Hp), f32)          # b_ir+b_hr | b_iz+b_hz | b_in
    bx_f = bx_f.at[:, 0:H].set(br)
    bx_f = bx_f.at[:, Hp:Hp + H].set(bz)
    bx_f = bx_f.at[:, 2 * Hp:2 * Hp + H].set(bin_)

    wh_f = jnp.zeros((Hp, 3 * Hp), f32)
    wh_f = wh_f.at[:H, 0:H].set(whr)
    wh_f = wh_f.at[:H, Hp:Hp + H].set(whz)
    wh_f = wh_f.at[:H, 2 * Hp:2 * Hp + H].set(whn)

    bhn_p = jnp.zeros((1, Hp), f32).at[:, :H].set(bhn)

    # Hoisted input projection: one large batched matmul, emitted directly in
    # time-major layout (no separately materialized transpose of x).
    # TODO(synk): for production sizes this can also be a tiled pallas matmul.
    xproj = jnp.einsum(
        "bti,ig->tbg", x_bsf[:, :T, :], wx_f,
        precision=lax.Precision.HIGHEST,
        preferred_element_type=jnp.float32) + bx_f            # (T, B, 3Hp)
    xproj = jnp.pad(xproj, ((0, Tp - T), (0, Bp - B), (0, 0)))  # (Tp, Bp, 3Hp)

    h0 = jnp.pad(hidden[0], ((0, Bp - B), (0, Hp - H)))         # (Bp, Hp)
    lens_arr = jnp.zeros((Bp, 1), jnp.int32).at[:B, 0].set(jnp.asarray(lens_np))

    out_p, hN_p = pl.pallas_call(
        _gru_chunk_kernel,
        out_shape=(
            jax.ShapeDtypeStruct((Tp, Bp, Hp), jnp.float32),
            jax.ShapeDtypeStruct((Bp, Hp), jnp.float32),
        ),
        grid_spec=pltpu.PrefetchScalarGridSpec(
            num_scalar_prefetch=0,
            grid=(num_chunks,),
            in_specs=[
                pl.BlockSpec((Tc, Bp, 3 * Hp), lambda c: (c, 0, 0)),  # xproj chunk
                pl.BlockSpec((Bp, 1), lambda c: (0, 0)),              # lens
                pl.BlockSpec((Bp, Hp), lambda c: (0, 0)),             # h0
                pl.BlockSpec((Hp, 3 * Hp), lambda c: (0, 0)),         # fused Wh
                pl.BlockSpec((1, Hp), lambda c: (0, 0)),              # b_hn
            ],
            out_specs=[
                pl.BlockSpec((Tc, Bp, Hp), lambda c: (c, 0, 0)),      # outputs
                pl.BlockSpec((Bp, Hp), lambda c: (0, 0)),             # final hidden
            ],
            scratch_shapes=[pltpu.VMEM((Bp, Hp), jnp.float32)],       # carried h
        ),
        compiler_params=pltpu.CompilerParams(
            dimension_semantics=("arbitrary",)),                      # serial carry
    )(xproj, lens_arr, h0, wh_f, bhn_p)

    output = out_p[:T, :B, :H]          # strip time/batch/hidden padding
    h_last = hN_p[:B, :H][None]         # (1, B, H)
    return output, h_last


def init_gru_params(key, input_size, hidden_size):
    """Deterministic GRU params; PyTorch-style U(-1/sqrt(H), 1/sqrt(H)).
    Weights stored transposed per gate: (I, H) / (H, H)."""
    k = 1.0 / np.sqrt(hidden_size)
    keys = jax.random.split(key, 10)
    u = lambda kk, shape: jax.random.uniform(kk, shape, jnp.float32, -k, k)
    wxr = u(keys[0], (input_size, hidden_size))
    wxz = u(keys[1], (input_size, hidden_size))
    wxn = u(keys[2], (input_size, hidden_size))
    whr = u(keys[3], (hidden_size, hidden_size))
    whz = u(keys[4], (hidden_size, hidden_size))
    whn = u(keys[5], (hidden_size, hidden_size))
    # b_ir+b_hr and b_iz+b_hz fold; b_in / b_hn must stay separate (r gating).
    br = u(keys[6], (1, hidden_size)) + u(keys[7], (1, hidden_size))
    bz = u(keys[8], (1, hidden_size)) + u(keys[9], (1, hidden_size))
    k2 = jax.random.split(keys[0], 2)
    bin_ = u(k2[0], (1, hidden_size))
    bhn = u(k2[1], (1, hidden_size))
    return (wxr, wxz, wxn, whr, whz, whn, br, bz, bin_, bhn)


def _reference_forward(x_bsf, hidden, lens, params):
    """Pure-numpy reference of the packed GRU (for correctness check)."""
    lens_np = np.asarray(lens)
    T = int(lens_np.max())
    B, _, _ = x_bsf.shape
    H = hidden.shape[-1]
    h = np.array(hidden[0])
    x = np.array(x_bsf)
    wxr, wxz, wxn, whr, whz, whn, br, bz, bin_, bhn = [np.array(a) for a in params]
    outs = np.zeros((T, B, H), np.float32)
    for t in range(T):
        xt = x[:, t, :]
        r = 1 / (1 + np.exp(-(xt @ wxr + h @ whr + br)))
        z = 1 / (1 + np.exp(-(xt @ wxz + h @ whz + bz)))
        n = np.tanh(xt @ wxn + bin_ + r * (h @ whn + bhn))
        h_new = (1 - z) * n + z * h
        valid = (lens_np > t)[:, None]
        h = np.where(valid, h_new, h)
        outs[t] = np.where(valid, h_new, 0.0)
    return outs, h[None]


if __name__ == "__main__":
    # Small shapes consistent with the module: input=(batch, seq, input_size)
    batch, seq, input_size, hidden_size = 2, 8, 16, 32
    key = jax.random.PRNGKey(0)
    k_x, k_h, k_p = jax.random.split(key, 3)

    x = jax.random.normal(k_x, (batch, seq, input_size), jnp.float32)
    h0 = jax.random.normal(k_h, (1, batch, hidden_size), jnp.float32)
    lens = [8, 5]                                   # variable lengths (host ints)
    params = init_gru_params(k_p, input_size, hidden_size)

    # time_chunk=4 -> 2 grid steps, exercises the cross-chunk state carry.
    out, h_last = decoder_rnn_forward(x, h0, lens, params, time_chunk=4)
    jax.block_until_ready((out, h_last))

    # Sanity check against a pure-numpy reference of the same semantics.
    out_ref, h_ref = _reference_forward(x, h0, lens, params)
    np.testing.assert_allclose(np.array(out), out_ref, rtol=2e-4, atol=2e-4)
    np.testing.assert_allclose(np.array(h_last), h_ref, rtol=2e-4, atol=2e-4)

    assert out.shape == (max(lens), batch, hidden_size)
    assert h_last.shape == (1, batch, hidden_size)
    print("KERNEL_OK")
</pallas_src>

<mosaic_0001>
module attributes {stable_mosaic.version = 11 : i64} {
  func.func @_gru_chunk_kernel(%arg0: i32, %arg1: memref<4x8x384xf32, #tpu.memory_space<vmem>>, %arg2: memref<8x1xi32, #tpu.memory_space<vmem>>, %arg3: memref<8x128xf32, #tpu.memory_space<vmem>>, %arg4: memref<128x384xf32, #tpu.memory_space<vmem>>, %arg5: memref<1x128xf32, #tpu.memory_space<vmem>>, %arg6: memref<4x8x128xf32, #tpu.memory_space<vmem>>, %arg7: memref<8x128xf32, #tpu.memory_space<vmem>>, %arg8: memref<8x128xf32, #tpu.memory_space<vmem>>) attributes {dimension_semantics = [#tpu.dimension_semantics<arbitrary>], iteration_bounds = array<i64: 2>, scalar_prefetch = 0 : i64, scratch_operands = 1 : i64, tpu.core_type = #tpu.core_type<tc>, window_params = [{transform_indices = @transform_0, window_bounds = array<i64: 4, 8, 384>}, {pipeline_mode = #tpu.pipeline_mode<synchronous>, transform_indices = @transform_1, window_bounds = array<i64: 8, 1>}, {pipeline_mode = #tpu.pipeline_mode<synchronous>, transform_indices = @transform_2, window_bounds = array<i64: 8, 128>}, {pipeline_mode = #tpu.pipeline_mode<synchronous>, transform_indices = @transform_3, window_bounds = array<i64: 128, 384>}, {pipeline_mode = #tpu.pipeline_mode<synchronous>, transform_indices = @transform_4, window_bounds = array<i64: 1, 128>}, {transform_indices = @transform_5, window_bounds = array<i64: 4, 8, 128>}, {pipeline_mode = #tpu.pipeline_mode<synchronous>, transform_indices = @transform_6, window_bounds = array<i64: 8, 128>}]} {
    %c0_i32 = arith.constant 0 : i32
    %0 = arith.cmpi eq, %arg0, %c0_i32 : i32
    %1 = arith.extui %0 : i1 to i32
    %c0_i32_0 = arith.constant 0 : i32
    %2 = arith.cmpi ne, %1, %c0_i32_0 : i32
    scf.if %2 {
      %c0_49 = arith.constant 0 : index
      %c0_50 = arith.constant 0 : index
      %194 = vector.load %arg3[%c0_49, %c0_50] : memref<8x128xf32, #tpu.memory_space<vmem>>, vector<8x128xf32>
      %c0_51 = arith.constant 0 : index
      %c0_52 = arith.constant 0 : index
      %195 = vector.load %arg8[%c0_51, %c0_52] : memref<8x128xf32, #tpu.memory_space<vmem>>, vector<8x128xf32>
      tpu.vector_store %arg8[%c0_51, %c0_52], %194 {strides = array<i32>} : memref<8x128xf32, #tpu.memory_space<vmem>>, vector<8x128xf32>,
    } else {
    }
    %c0 = arith.constant 0 : index
    %c0_1 = arith.constant 0 : index
    %3 = vector.load %arg4[%c0, %c0_1] : memref<128x384xf32, #tpu.memory_space<vmem>>, vector<128x384xf32>
    %c0_2 = arith.constant 0 : index
    %c0_3 = arith.constant 0 : index
    %4 = vector.load %arg2[%c0_2, %c0_3] : memref<8x1xi32, #tpu.memory_space<vmem>>, vector<8x1xi32>
    %c0_4 = arith.constant 0 : index
    %c0_5 = arith.constant 0 : index
    %5 = vector.load %arg5[%c0_4, %c0_5] : memref<1x128xf32, #tpu.memory_space<vmem>>, vector<1x128xf32>
    %6 = vector.shape_cast %5 : vector<1x128xf32> to vector<1x128xf32>
    %7 = vector.broadcast %6 : vector<1x128xf32> to vector<8x128xf32>
    %c4_i32 = arith.constant 4 : i32
    %8 = arith.muli %arg0, %c4_i32 : i32
    %c0_6 = arith.constant 0 : index
    %c0_7 = arith.constant 0 : index
    %9 = vector.load %arg8[%c0_6, %c0_7] : memref<8x128xf32, #tpu.memory_space<vmem>>, vector<8x128xf32>
    %c0_i32_8 = arith.constant 0 : i32
    %10 = arith.index_cast %c0_i32_8 : i32 to index
    %c0_9 = arith.constant 0 : index
    %c0_10 = arith.constant 0 : index
    %11 = vector.load %arg1[%10, %c0_9, %c0_10] : memref<4x8x384xf32, #tpu.memory_space<vmem>>, vector<1x8x384xf32>
    %12 = vector.shape_cast %11 : vector<1x8x384xf32> to vector<8x384xf32>
    %cst = arith.constant dense<0.000000e+00> : vector<8x384xf32>
    %13 = tpu.matmul %9, %3, %cst {dimension_numbers = #tpu.dot_dimension_numbers<[1], [0], [0], [1], [0, 0, 1, 1], [], []>} : vector<8x128xf32>, vector<128x384xf32>, vector<8x384xf32> -> vector<8x384xf32>
    %14 = vector.extract_strided_slice %12 {offsets = [0, 0], sizes = [8, 128], strides = [1, 1]} : vector<8x384xf32> to vector<8x128xf32>
    %15 = vector.extract_strided_slice %13 {offsets = [0, 0], sizes = [8, 128], strides = [1, 1]} : vector<8x384xf32> to vector<8x128xf32>
    %16 = arith.addf %14, %15 : vector<8x128xf32>
    %17 = arith.negf %16 : vector<8x128xf32>
    %18 = math.exp %17 : vector<8x128xf32>
    %cst_11 = arith.constant 1.000000e+00 : f32
    %19 = vector.broadcast %cst_11 : f32 to vector<8x128xf32>
    %20 = arith.addf %19, %18 : vector<8x128xf32>
    %21 = arith.divf %19, %20 : vector<8x128xf32>
    %22 = vector.extract_strided_slice %12 {offsets = [0, 128], sizes = [8, 128], strides = [1, 1]} : vector<8x384xf32> to vector<8x128xf32>
    %23 = vector.extract_strided_slice %13 {offsets = [0, 128], sizes = [8, 128], strides = [1, 1]} : vector<8x384xf32> to vector<8x128xf32>
    %24 = arith.addf %22, %23 : vector<8x128xf32>
    %25 = arith.negf %24 : vector<8x128xf32>
    %26 = math.exp %25 : vector<8x128xf32>
    %cst_12 = arith.constant 1.000000e+00 : f32
    %27 = vector.broadcast %cst_12 : f32 to vector<8x128xf32>
    %28 = arith.addf %27, %26 : vector<8x128xf32>
    %29 = arith.divf %27, %28 : vector<8x128xf32>
    %30 = vector.extract_strided_slice %12 {offsets = [0, 256], sizes = [8, 128], strides = [1, 1]} : vector<8x384xf32> to vector<8x128xf32>
    %31 = vector.extract_strided_slice %13 {offsets = [0, 256], sizes = [8, 128], strides = [1, 1]} : vector<8x384xf32> to vector<8x128xf32>
    %32 = arith.addf %31, %7 : vector<8x128xf32>
    %33 = arith.mulf %21, %32 : vector<8x128xf32>
    %34 = arith.addf %30, %33 : vector<8x128xf32>
    %35 = math.tanh %34 : vector<8x128xf32>
    %cst_13 = arith.constant 1.000000e+00 : f32
    %36 = vector.broadcast %cst_13 : f32 to vector<8x128xf32>
    %37 = arith.subf %36, %29 : vector<8x128xf32>
    %38 = arith.mulf %37, %35 : vector<8x128xf32>
    %39 = arith.mulf %29, %9 : vector<8x128xf32>
    %40 = arith.addf %38, %39 : vector<8x128xf32>
    %41 = arith.addi %8, %c0_i32_8 : i32
    %42 = vector.broadcast %41 : i32 to vector<8x1xi32>
    %43 = arith.cmpi sgt, %4, %42 : vector<8x1xi32>
    %44 = vector.shape_cast %43 : vector<8x1xi1> to vector<8x1xi1>
    %45 = vector.broadcast %44 : vector<8x1xi1> to vector<8x128xi1>
    %46 = arith.select %45, %40, %9 : vector<8x128xi1>, vector<8x128xf32>
    %cst_14 = arith.constant 0.000000e+00 : f32
    %47 = vector.shape_cast %43 : vector<8x1xi1> to vector<8x1xi1>
    %48 = vector.broadcast %47 : vector<8x1xi1> to vector<8x128xi1>
    %49 = vector.broadcast %cst_14 : f32 to vector<8x128xf32>
    %50 = arith.select %48, %40, %49 : vector<8x128xi1>, vector<8x128xf32>
    %51 = arith.index_cast %c0_i32_8 : i32 to index
    %c0_15 = arith.constant 0 : index
    %c0_16 = arith.constant 0 : index
    %52 = vector.load %arg6[%51, %c0_15, %c0_16] : memref<4x8x128xf32, #tpu.memory_space<vmem>>, vector<1x8x128xf32>
    %53 = vector.shape_cast %52 : vector<1x8x128xf32> to vector<8x128xf32>
    %54 = vector.shape_cast %50 : vector<8x128xf32> to vector<1x8x128xf32>
    tpu.vector_store %arg6[%51, %c0_15, %c0_16], %54 {strides = array<i32>} : memref<4x8x128xf32, #tpu.memory_space<vmem>>, vector<1x8x128xf32>,
    %c1_i32 = arith.constant 1 : i32
    %55 = arith.index_cast %c1_i32 : i32 to index
    %c0_17 = arith.constant 0 : index
    %c0_18 = arith.constant 0 : index
    %56 = vector.load %arg1[%55, %c0_17, %c0_18] : memref<4x8x384xf32, #tpu.memory_space<vmem>>, vector<1x8x384xf32>
    %57 = vector.shape_cast %56 : vector<1x8x384xf32> to vector<8x384xf32>
    %cst_19 = arith.constant dense<0.000000e+00> : vector<8x384xf32>
    %58 = tpu.matmul %46, %3, %cst_19 {dimension_numbers = #tpu.dot_dimension_numbers<[1], [0], [0], [1], [0, 0, 1, 1], [], []>} : vector<8x128xf32>, vector<128x384xf32>, vector<8x384xf32> -> vector<8x384xf32>
    %59 = vector.extract_strided_slice %57 {offsets = [0, 0], sizes = [8, 128], strides = [1, 1]} : vector<8x384xf32> to vector<8x128xf32>
    %60 = vector.extract_strided_slice %58 {offsets = [0, 0], sizes = [8, 128], strides = [1, 1]} : vector<8x384xf32> to vector<8x128xf32>
    %61 = arith.addf %59, %60 : vector<8x128xf32>
    %62 = arith.negf %61 : vector<8x128xf32>
    %63 = math.exp %62 : vector<8x128xf32>
    %cst_20 = arith.constant 1.000000e+00 : f32
    %64 = vector.broadcast %cst_20 : f32 to vector<8x128xf32>
    %65 = arith.addf %64, %63 : vector<8x128xf32>
    %66 = arith.divf %64, %65 : vector<8x128xf32>
    %67 = vector.extract_strided_slice %57 {offsets = [0, 128], sizes = [8, 128], strides = [1, 1]} : vector<8x384xf32> to vector<8x128xf32>
    %68 = vector.extract_strided_slice %58 {offsets = [0, 128], sizes = [8, 128], strides = [1, 1]} : vector<8x384xf32> to vector<8x128xf32>
    %69 = arith.addf %67, %68 : vector<8x128xf32>
    %70 = arith.negf %69 : vector<8x128xf32>
    %71 = math.exp %70 : vector<8x128xf32>
    %cst_21 = arith.constant 1.000000e+00 : f32
    %72 = vector.broadcast %cst_21 : f32 to vector<8x128xf32>
    %73 = arith.addf %72, %71 : vector<8x128xf32>
    %74 = arith.divf %72, %73 : vector<8x128xf32>
    %75 = vector.extract_strided_slice %57 {offsets = [0, 256], sizes = [8, 128], strides = [1, 1]} : vector<8x384xf32> to vector<8x128xf32>
    %76 = vector.extract_strided_slice %58 {offsets = [0, 256], sizes = [8, 128], strides = [1, 1]} : vector<8x384xf32> to vector<8x128xf32>
    %77 = arith.addf %76, %7 : vector<8x128xf32>
    %78 = arith.mulf %66, %77 : vector<8x128xf32>
    %79 = arith.addf %75, %78 : vector<8x128xf32>
    %80 = math.tanh %79 : vector<8x128xf32>
    %cst_22 = arith.constant 1.000000e+00 : f32
    %81 = vector.broadcast %cst_22 : f32 to vector<8x128xf32>
    %82 = arith.subf %81, %74 : vector<8x128xf32>
    %83 = arith.mulf %82, %80 : vector<8x128xf32>
    %84 = arith.mulf %74, %46 : vector<8x128xf32>
    %85 = arith.addf %83, %84 : vector<8x128xf32>
    %86 = arith.addi %8, %c1_i32 : i32
    %87 = vector.broadcast %86 : i32 to vector<8x1xi32>
    %88 = arith.cmpi sgt, %4, %87 : vector<8x1xi32>
    %89 = vector.shape_cast %88 : vector<8x1xi1> to vector<8x1xi1>
    %90 = vector.broadcast %89 : vector<8x1xi1> to vector<8x128xi1>
    %91 = arith.select %90, %85, %46 : vector<8x128xi1>, vector<8x128xf32>
    %cst_23 = arith.constant 0.000000e+00 : f32
    %92 = vector.shape_cast %88 : vector<8x1xi1> to vector<8x1xi1>
    %93 = vector.broadcast %92 : vector<8x1xi1> to vector<8x128xi1>
    %94 = vector.broadcast %cst_23 : f32 to vector<8x128xf32>
    %95 = arith.select %93, %85, %94 : vector<8x128xi1>, vector<8x128xf32>
    %96 = arith.index_cast %c1_i32 : i32 to index
    %c0_24 = arith.constant 0 : index
    %c0_25 = arith.constant 0 : index
    %97 = vector.load %arg6[%96, %c0_24, %c0_25] : memref<4x8x128xf32, #tpu.memory_space<vmem>>, vector<1x8x128xf32>
    %98 = vector.shape_cast %97 : vector<1x8x128xf32> to vector<8x128xf32>
    %99 = vector.shape_cast %95 : vector<8x128xf32> to vector<1x8x128xf32>
    tpu.vector_store %arg6[%96, %c0_24, %c0_25], %99 {strides = array<i32>} : memref<4x8x128xf32, #tpu.memory_space<vmem>>, vector<1x8x128xf32>,
    %c2_i32 = arith.constant 2 : i32
    %100 = arith.index_cast %c2_i32 : i32 to index
    %c0_26 = arith.constant 0 : index
    %c0_27 = arith.constant 0 : index
    %101 = vector.load %arg1[%100, %c0_26, %c0_27] : memref<4x8x384xf32, #tpu.memory_space<vmem>>, vector<1x8x384xf32>
    %102 = vector.shape_cast %101 : vector<1x8x384xf32> to vector<8x384xf32>
    %cst_28 = arith.constant dense<0.000000e+00> : vector<8x384xf32>
    %103 = tpu.matmul %91, %3, %cst_28 {dimension_numbers = #tpu.dot_dimension_numbers<[1], [0], [0], [1], [0, 0, 1, 1], [], []>} : vector<8x128xf32>, vector<128x384xf32>, vector<8x384xf32> -> vector<8x384xf32>
    %104 = vector.extract_strided_slice %102 {offsets = [0, 0], sizes = [8, 128], strides = [1, 1]} : vector<8x384xf32> to vector<8x128xf32>
    %105 = vector.extract_strided_slice %103 {offsets = [0, 0], sizes = [8, 128], strides = [1, 1]} : vector<8x384xf32> to vector<8x128xf32>
    %106 = arith.addf %104, %105 : vector<8x128xf32>
    %107 = arith.negf %106 : vector<8x128xf32>
    %108 = math.exp %107 : vector<8x128xf32>
    %cst_29 = arith.constant 1.000000e+00 : f32
    %109 = vector.broadcast %cst_29 : f32 to vector<8x128xf32>
    %110 = arith.addf %109, %108 : vector<8x128xf32>
    %111 = arith.divf %109, %110 : vector<8x128xf32>
    %112 = vector.extract_strided_slice %102 {offsets = [0, 128], sizes = [8, 128], strides = [1, 1]} : vector<8x384xf32> to vector<8x128xf32>
    %113 = vector.extract_strided_slice %103 {offsets = [0, 128], sizes = [8, 128], strides = [1, 1]} : vector<8x384xf32> to vector<8x128xf32>
    %114 = arith.addf %112, %113 : vector<8x128xf32>
    %115 = arith.negf %114 : vector<8x128xf32>
    %116 = math.exp %115 : vector<8x128xf32>
    %cst_30 = arith.constant 1.000000e+00 : f32
    %117 = vector.broadcast %cst_30 : f32 to vector<8x128xf32>
    %118 = arith.addf %117, %116 : vector<8x128xf32>
    %119 = arith.divf %117, %118 : vector<8x128xf32>
    %120 = vector.extract_strided_slice %102 {offsets = [0, 256], sizes = [8, 128], strides = [1, 1]} : vector<8x384xf32> to vector<8x128xf32>
    %121 = vector.extract_strided_slice %103 {offsets = [0, 256], sizes = [8, 128], strides = [1, 1]} : vector<8x384xf32> to vector<8x128xf32>
    %122 = arith.addf %121, %7 : vector<8x128xf32>
    %123 = arith.mulf %111, %122 : vector<8x128xf32>
    %124 = arith.addf %120, %123 : vector<8x128xf32>
    %125 = math.tanh %124 : vector<8x128xf32>
    %cst_31 = arith.constant 1.000000e+00 : f32
    %126 = vector.broadcast %cst_31 : f32 to vector<8x128xf32>
    %127 = arith.subf %126, %119 : vector<8x128xf32>
    %128 = arith.mulf %127, %125 : vector<8x128xf32>
    %129 = arith.mulf %119, %91 : vector<8x128xf32>
    %130 = arith.addf %128, %129 : vector<8x128xf32>
    %131 = arith.addi %8, %c2_i32 : i32
    %132 = vector.broadcast %131 : i32 to vector<8x1xi32>
    %133 = arith.cmpi sgt, %4, %132 : vector<8x1xi32>
    %134 = vector.shape_cast %133 : vector<8x1xi1> to vector<8x1xi1>
    %135 = vector.broadcast %134 : vector<8x1xi1> to vector<8x128xi1>
    %136 = arith.select %135, %130, %91 : vector<8x128xi1>, vector<8x128xf32>
    %cst_32 = arith.constant 0.000000e+00 : f32
    %137 = vector.shape_cast %133 : vector<8x1xi1> to vector<8x1xi1>
    %138 = vector.broadcast %137 : vector<8x1xi1> to vector<8x128xi1>
    %139 = vector.broadcast %cst_32 : f32 to vector<8x128xf32>
    %140 = arith.select %138, %130, %139 : vector<8x128xi1>, vector<8x128xf32>
    %141 = arith.index_cast %c2_i32 : i32 to index
    %c0_33 = arith.constant 0 : index
    %c0_34 = arith.constant 0 : index
    %142 = vector.load %arg6[%141, %c0_33, %c0_34] : memref<4x8x128xf32, #tpu.memory_space<vmem>>, vector<1x8x128xf32>
    %143 = vector.shape_cast %142 : vector<1x8x128xf32> to vector<8x128xf32>
    %144 = vector.shape_cast %140 : vector<8x128xf32> to vector<1x8x128xf32>
    tpu.vector_store %arg6[%141, %c0_33, %c0_34], %144 {strides = array<i32>} : memref<4x8x128xf32, #tpu.memory_space<vmem>>, vector<1x8x128xf32>,
    %c3_i32 = arith.constant 3 : i32
    %145 = arith.index_cast %c3_i32 : i32 to index
    %c0_35 = arith.constant 0 : index
    %c0_36 = arith.constant 0 : index
    %146 = vector.load %arg1[%145, %c0_35, %c0_36] : memref<4x8x384xf32, #tpu.memory_space<vmem>>, vector<1x8x384xf32>
    %147 = vector.shape_cast %146 : vector<1x8x384xf32> to vector<8x384xf32>
    %cst_37 = arith.constant dense<0.000000e+00> : vector<8x384xf32>
    %148 = tpu.matmul %136, %3, %cst_37 {dimension_numbers = #tpu.dot_dimension_numbers<[1], [0], [0], [1], [0, 0, 1, 1], [], []>} : vector<8x128xf32>, vector<128x384xf32>, vector<8x384xf32> -> vector<8x384xf32>
    %149 = vector.extract_strided_slice %147 {offsets = [0, 0], sizes = [8, 128], strides = [1, 1]} : vector<8x384xf32> to vector<8x128xf32>
    %150 = vector.extract_strided_slice %148 {offsets = [0, 0], sizes = [8, 128], strides = [1, 1]} : vector<8x384xf32> to vector<8x128xf32>
    %151 = arith.addf %149, %150 : vector<8x128xf32>
    %152 = arith.negf %151 : vector<8x128xf32>
    %153 = math.exp %152 : vector<8x128xf32>
    %cst_38 = arith.constant 1.000000e+00 : f32
    %154 = vector.broadcast %cst_38 : f32 to vector<8x128xf32>
    %155 = arith.addf %154, %153 : vector<8x128xf32>
    %156 = arith.divf %154, %155 : vector<8x128xf32>
    %157 = vector.extract_strided_slice %147 {offsets = [0, 128], sizes = [8, 128], strides = [1, 1]} : vector<8x384xf32> to vector<8x128xf32>
    %158 = vector.extract_strided_slice %148 {offsets = [0, 128], sizes = [8, 128], strides = [1, 1]} : vector<8x384xf32> to vector<8x128xf32>
    %159 = arith.addf %157, %158 : vector<8x128xf32>
    %160 = arith.negf %159 : vector<8x128xf32>
    %161 = math.exp %160 : vector<8x128xf32>
    %cst_39 = arith.constant 1.000000e+00 : f32
    %162 = vector.broadcast %cst_39 : f32 to vector<8x128xf32>
    %163 = arith.addf %162, %161 : vector<8x128xf32>
    %164 = arith.divf %162, %163 : vector<8x128xf32>
    %165 = vector.extract_strided_slice %147 {offsets = [0, 256], sizes = [8, 128], strides = [1, 1]} : vector<8x384xf32> to vector<8x128xf32>
    %166 = vector.extract_strided_slice %148 {offsets = [0, 256], sizes = [8, 128], strides = [1, 1]} : vector<8x384xf32> to vector<8x128xf32>
    %167 = arith.addf %166, %7 : vector<8x128xf32>
    %168 = arith.mulf %156, %167 : vector<8x128xf32>
    %169 = arith.addf %165, %168 : vector<8x128xf32>
    %170 = math.tanh %169 : vector<8x128xf32>
    %cst_40 = arith.constant 1.000000e+00 : f32
    %171 = vector.broadcast %cst_40 : f32 to vector<8x128xf32>
    %172 = arith.subf %171, %164 : vector<8x128xf32>
    %173 = arith.mulf %172, %170 : vector<8x128xf32>
    %174 = arith.mulf %164, %136 : vector<8x128xf32>
    %175 = arith.addf %173, %174 : vector<8x128xf32>
    %176 = arith.addi %8, %c3_i32 : i32
    %177 = vector.broadcast %176 : i32 to vector<8x1xi32>
    %178 = arith.cmpi sgt, %4, %177 : vector<8x1xi32>
    %179 = vector.shape_cast %178 : vector<8x1xi1> to vector<8x1xi1>
    %180 = vector.broadcast %179 : vector<8x1xi1> to vector<8x128xi1>
    %181 = arith.select %180, %175, %136 : vector<8x128xi1>, vector<8x128xf32>
    %cst_41 = arith.constant 0.000000e+00 : f32
    %182 = vector.shape_cast %178 : vector<8x1xi1> to vector<8x1xi1>
    %183 = vector.broadcast %182 : vector<8x1xi1> to vector<8x128xi1>
    %184 = vector.broadcast %cst_41 : f32 to vector<8x128xf32>
    %185 = arith.select %183, %175, %184 : vector<8x128xi1>, vector<8x128xf32>
    %186 = arith.index_cast %c3_i32 : i32 to index
    %c0_42 = arith.constant 0 : index
    %c0_43 = arith.constant 0 : index
    %187 = vector.load %arg6[%186, %c0_42, %c0_43] : memref<4x8x128xf32, #tpu.memory_space<vmem>>, vector<1x8x128xf32>
    %188 = vector.shape_cast %187 : vector<1x8x128xf32> to vector<8x128xf32>
    %189 = vector.shape_cast %185 : vector<8x128xf32> to vector<1x8x128xf32>
    tpu.vector_store %arg6[%186, %c0_42, %c0_43], %189 {strides = array<i32>} : memref<4x8x128xf32, #tpu.memory_space<vmem>>, vector<1x8x128xf32>,
    %c4_i32_44 = arith.constant 4 : i32
    %c0_45 = arith.constant 0 : index
    %c0_46 = arith.constant 0 : index
    %190 = vector.load %arg8[%c0_45, %c0_46] : memref<8x128xf32, #tpu.memory_space<vmem>>, vector<8x128xf32>
    tpu.vector_store %arg8[%c0_45, %c0_46], %181 {strides = array<i32>} : memref<8x128xf32, #tpu.memory_space<vmem>>, vector<8x128xf32>,
    %c1_i32_47 = arith.constant 1 : i32
    %191 = arith.cmpi eq, %arg0, %c1_i32_47 : i32
    %192 = arith.extui %191 : i1 to i32
    %c0_i32_48 = arith.constant 0 : i32
    %193 = arith.cmpi ne, %192, %c0_i32_48 : i32
    scf.if %193 {
      %c0_49 = arith.constant 0 : index
      %c0_50 = arith.constant 0 : index
      %194 = vector.load %arg7[%c0_49, %c0_50] : memref<8x128xf32, #tpu.memory_space<vmem>>, vector<8x128xf32>
      tpu.vector_store %arg7[%c0_49, %c0_50], %181 {strides = array<i32>} : memref<8x128xf32, #tpu.memory_space<vmem>>, vector<8x128xf32>,
    } else {
    }
    return
  }
  func.func @transform_0(%arg0: i32) -> (i32, i32, i32) {
    %c0_i32 = arith.constant 0 : i32
    %c0_i32_0 = arith.constant 0 : i32
    %c0_i32_1 = arith.constant 0 : i32
    return %arg0, %c0_i32, %c0_i32_0 : i32, i32, i32
  }
  func.func @transform_1(%arg0: i32) -> (i32, i32) {
    %c0_i32 = arith.constant 0 : i32
    %c0_i32_0 = arith.constant 0 : i32
    %c0_i32_1 = arith.constant 0 : i32
    return %c0_i32, %c0_i32_0 : i32, i32
  }
  func.func @transform_2(%arg0: i32) -> (i32, i32) {
    %c0_i32 = arith.constant 0 : i32
    %c0_i32_0 = arith.constant 0 : i32
    %c0_i32_1 = arith.constant 0 : i32
    return %c0_i32, %c0_i32_0 : i32, i32
  }
  func.func @transform_3(%arg0: i32) -> (i32, i32) {
    %c0_i32 = arith.constant 0 : i32
    %c0_i32_0 = arith.constant 0 : i32
    %c0_i32_1 = arith.constant 0 : i32
    return %c0_i32, %c0_i32_0 : i32, i32
  }
  func.func @transform_4(%arg0: i32) -> (i32, i32) {
    %c0_i32 = arith.constant 0 : i32
    %c0_i32_0 = arith.constant 0 : i32
    %c0_i32_1 = arith.constant 0 : i32
    return %c0_i32, %c0_i32_0 : i32, i32
  }
  func.func @transform_5(%arg0: i32) -> (i32, i32, i32) {
    %c0_i32 = arith.constant 0 : i32
    %c0_i32_0 = arith.constant 0 : i32
    %c0_i32_1 = arith.constant 0 : i32
    return %arg0, %c0_i32, %c0_i32_0 : i32, i32, i32
  }
  func.func @transform_6(%arg0: i32) -> (i32, i32) {
    %c0_i32 = arith.constant 0 : i32
    %c0_i32_0 = arith.constant 0 : i32
    %c0_i32_1 = arith.constant 0 : i32
    return %c0_i32, %c0_i32_0 : i32, i32
  }
}

</mosaic_0001>

<bundles_post_ra>
// kernel: tpu_custom_call.1
= control target key start
LH: loop header
LB: loop body
LE: loop exit
PB: predicated region body
PF: predicated region fallthrough
CT: control target
= control target key end

     0   :  { %12 = vsyncpa [#allocation4], 0  ;;  %s2482_s0 = inlined_call_operand.hbm [shape: f32[8,8,384], index: 0, kind: input, shape index: {}]   ;;  %s2483_s1 = inlined_call_operand.vmem [shape: s32[8,1], index: 1, kind: input, shape index: {}]   ;;  %s2484_s2 = inlined_call_operand.vmem [shape: f32[8,128], index: 2, kind: input, shape index: {}]   ;;  %s2485_s3 = inlined_call_operand.hbm [shape: f32[128,384], index: 3, kind: input, shape index: {}]   ;;  %s2486_s4 = inlined_call_operand.vmem [shape: f32[1,128], index: 4, kind: input, shape index: {}]   ;;  %s2487_s5 = inlined_call_operand.hbm [shape: f32[8,8,128], index: 5, kind: output, shape index: {0}]   ;;  %s2488_s6 = inlined_call_operand.hbm [shape: f32[8,128], index: 6, kind: output, shape index: {1}]  }
   0x1   :  { %14 = vsyncpa [#allocation4 + $0x1], 0 }
   0x2   :  { %15 = vsyncpa [#allocation7], 0 }
   0x3   :  { %16 = vsyncpa [#allocation5], 0 }
   0x4   :  { %18 = vsyncpa [#allocation5 + $0x1], 0 }
   0x5   :  { %19 = vsyncpa [#allocation10], 0  ;;  %s1987_s21 = smov 0   ;;  %s1989_s22 = smov 0  }
   0x6   :  { %s1991_s23 = smov 0   ;;  %s1993_s24 = smov 0  }
   0x7 LB: > { %s2008_s25 = sadd.s32 4294967295, %s1938_s24   ;;  %s1189_s26 = sadd.s32 4294967294, %s1938_s24   ;;  %s1938_s24 = sphi %s1993_s24, %s2518_s24   ;;  %s1934_s23 = sphi %s1991_s23, %s2517_s23   ;;  %s1930_s22 = sphi %s1989_s22, %s2516_s22   ;;  %s1926_s21 = sphi %s1987_s21, %s2515_s21  }
   0x8   : > { %p45_p0 = scmp.ne.s32.totalorder %s1930_s22, %s1926_s21  ;;  %p2489_p1 = scmp.eq.s32.totalorder %s2008_s25, 0 }
   0x9   : > { %p159_p3 = scmp.eq.s32.totalorder %s1189_s26, 1  ;;  %p1190_p5 = scmp.ge.s32.totalorder %s1938_s24, 1 }
   0xa   : > { %p2017_p4 = por %p2489_p1, %p45_p0  ;;  %p187_p7 = scmp.lt.s32.totalorder %s1938_s24, 3 }
   0xb   : > { %p2022_p6 = por %p159_p3, %p45_p0  ;;  %s1940_s30 = smov [#allocation6]  }
   0xc   : > { %s2494_s27 = scalar_select %p2017_p4, 1, 0 }
   0xd   : > { %s2495_s28 = scalar_select %p2022_p6, 1, 0 }
   0xe   : > { %p2028_p9 = pnand %p1190_p5, %p187_p7  ;;  %s205_s7 = sshll.u32 %s1940_s30, 4  ;;  %s2032_s7 = int_to_ptr.vmem [resolvable:$true] %s205_s7 }
   0xf   : > { %s2044_s9 = sadd.s32 1, %s1938_s24   ;;  %s32_s10 = sadd.s32 1, %s1934_s23 }
  0x10   : > { %s2496_s29 = scalar_select %p2028_p9, 1, 0 }
  0x11   : > { %p1678_p10 = pneg %p2028_p9  ;;  %s29_s11 = ssub.s32 %s1938_s24, %s2044_s9 }
  0x12   : > { %s1780_s14 = scalar_lea.hbm %s2485_s3, 6144 }
  0x13   : > { %p2039_p12 = pnand %p1678_p10, %p2489_p1  ;;  %p1781_p13 = scmp.ne.s32.totalorder %s2485_s3, %s1780_s14 }
  0x14   : > { %p1787_p7 = scmp.lt.u32.totalorder %s1780_s14, %s2485_s3 }
  0x15   : > { %p1782_p0 = pneg %p2039_p12 }
  0x17   : > { %p1783_p3 = pnand %p1782_p0, %p1781_p13 }
  0x19   : > { %p1784_p5 = pneg %p1783_p3 }
  0x1b   : > { %p1789_p10 = pnand %p1787_p7, %p1784_p5 }
  0x1d   : > { %1792 = shalt.err (!%p1789_p10)
}
  0x1e   : > { %s1793_s19 = scalar_lea.vmem %s2032_s7, 6144  ;;  %p1801_p2 = scmp.lt.s32.totalorder %s2032_s7, %s2032_s7 }
  0x1f   : > { %p1794_p11 = scmp.ne.s32.totalorder %s2032_s7, %s1793_s19  ;;  %p1802_p6 = scmp.lt.s32.totalorder %s1793_s19, %s1793_s19 }
  0x21   : > { %p1796_p8 = pnand %p1794_p11, %p1782_p0  ;;  %p1803_p4 = por %p1802_p6, %p1801_p2 }
  0x23   : > { %p1797_p1 = pneg %p1796_p8 }
  0x25   : > { %p1804_p9 = pnand %p1803_p4, %p1797_p1 }
  0x27   : > { %1807 = shalt.err (!%p1804_p9)
}
  0x28   : > { %s2492_s20 = smov 384   ;;  %s2493_s26 = smov 24  }
  0x29   : > { %1681 = dma.hbm_to_vmem [thread:$0]  (!%p2039_p12), %s2485_s3, 6144, %s2032_s7, [#allocation7], %s2492_s20, %s2492_s20, %s2493_s26  }
  0x2a   : > { %p30_p1 = scmp.eq.s32.totalorder %s29_s11, 0  ;;  %p39_p2 = scmp.ne.s32.totalorder %s1934_s23, %s1930_s22 }
  0x2b   : > { %p40_p4 = scmp.eq.s32.totalorder %s1938_s24, 0  ;;  %p1691_p6 = scmp.lt.s32.totalorder %s1938_s24, 2 }
  0x2c   : > { %s2078_s13 = scalar_select %p30_p1, %s1934_s23, %s32_s10  }
  0x2d   : > { %p41_p8 = por %p40_p4, %p39_p2  ;;  %p2498_p9 = scmp.eq.s32.totalorder %s2008_s25, 1 }
  0x2e   : > { %s222_s8 = sand.u32 1, %s1934_s23   ;;  %s1664_s15 = smul.u32 1536, %s1938_s24 }
  0x2f   : > { %p2082_p11 = por %p2498_p9, %p39_p2  ;;  %s1663_s16 = smul.u32 96, %s222_s8 }
  0x30   : > { %p2088_p13 = pnand %p1691_p6, %p41_p8  ;;  %s2095_s10 = scalar_lea.hbm %s2482_s0, %s1664_s15 }
  0x31   : > { %s226_s18 = scalar_lea.vmem [#allocation3], %s1663_s16  ;;  %s2099_s30 = scalar_lea.sflag [#allocation4], %s222_s8 }
  0x32   : > { %s234_s19 = sshll.u32 %s226_s18, 4  ;;  %s1808_s12 = scalar_lea.hbm %s2095_s10, 1536  ;;  %s2097_s19 = int_to_ptr.vmem [resolvable:$true] %s234_s19 }
  0x33   : > { %p1809_p12 = scmp.ne.s32.totalorder %s2095_s10, %s1808_s12  ;;  %p1810_p0 = pneg %p2088_p13 }
  0x34   : > { %s1813_s11 = scalar_lea.hbm %s2482_s0, 3072  ;;  %p1814_p7 = scmp.lt.u32.totalorder %s2095_s10, %s2482_s0 }
  0x35   : > { %p1811_p3 = pnand %p1810_p0, %p1809_p12  ;;  %p1815_p10 = scmp.lt.u32.totalorder %s1813_s11, %s1808_s12 }
  0x36   : > { %p1817_p2 = scmp.lt.u32.totalorder %s1808_s12, %s2095_s10 }
  0x37   : > { %p1812_p5 = pneg %p1811_p3  ;;  %p1816_p1 = por %p1815_p10, %p1814_p7 }
  0x39   : > { %p1818_p4 = por %p1817_p2, %p1816_p1 }
  0x3b   : > { %p1819_p6 = pnand %p1818_p4, %p1812_p5 }
  0x3d   : > { %1822 = shalt.err (!%p1819_p6)
}
  0x3e   : > { %s1823_s8 = scalar_lea.vmem %s2097_s19, 1536  ;;  %s1943_s16 = smov [#allocation3]  }
  0x3f   : > { %p1824_p8 = scmp.ne.s32.totalorder %s2097_s19, %s1823_s8  ;;  %s1828_s18 = sshll.u32 %s1943_s16, 4  ;;  %s1829_s18 = int_to_ptr.vmem [resolvable:$false] %s1828_s18 }
  0x40   : > { %s1830_s20 = scalar_lea.vmem %s1829_s18, 3072  ;;  %p1831_p3 = scmp.lt.s32.totalorder %s2097_s19, %s1829_s18 }
  0x41   : > { %p1826_p9 = pnand %p1824_p8, %p1810_p0  ;;  %p1832_p7 = scmp.lt.s32.totalorder %s1830_s20, %s1823_s8 }
  0x43   : > { %p1827_p12 = pneg %p1826_p9  ;;  %p1833_p10 = por %p1832_p7, %p1831_p3 }
  0x45   : > { %p1834_p1 = pnand %p1833_p10, %p1827_p12 }
  0x47   : > { %1837 = shalt.err (!%p1834_p1)
}
  0x48   : > { %s2501_s26 = smov 24   ;;  %s2502_s12 = smov 384  }
  0x49   : > { %1685 = dma.hbm_to_vmem [thread:$0]  (!%p2088_p13), %s2095_s10, 1536, %s2097_s19, %s2099_s30, %s2502_s12, %s2502_s12, %s2501_s26  }
  0x4a   : > { %p2503_p0 = scmp.ne.s32.totalorder %s2496_s29, 0 }
  0x4b   : > { %s2133_s15 = sand.u32 (!%p2503_p0), 1, %s1930_s22   ;;  %p2504_p5 = scmp.ne.s32.totalorder (!%p2503_p0), %s2494_s27, 0 }
  0x4c   : > { %246 = sbr.rel (%p2503_p0) target bundleno = 1227 (0x4cb), region = 40  ;;  %s249_s11 = scalar_lea.sflag (!%p2503_p0), [#allocation4], %s2133_s15 }
  0x4d   : > { %s1665_s7 = smul.u32 (!%p2503_p0), 96, %s2133_s15 }
  0x4f   : > { %s2137_s8 = scalar_lea.vmem (!%p2503_p0), [#allocation3], %s1665_s7 }
  0x53   : > { %1909 = dma.done.wait (%p2504_p5), %s249_s11, 1536  }
  0x54   : > { %1911 = vsyncadd (%p2504_p5), %s249_s11, 4294965760  ;;  %p2505_p13 = scmp.eq.s32.totalorder %s2008_s25, 0 }
  0x56   : > { %1913 = dma.done.wait (%p2505_p13), [#allocation7], 6144   ;;  %p2506_p2 = pmov %p2505_p13 }
  0x57   : > { %s1198_s29 = sshll.u32 %s2133_s15, 5  ;;  %p2507_p4 = scmp.ne.s32.totalorder %s2008_s25, 0 }
  0x58   : > { %1915 = vsyncadd (%p2506_p2), [#allocation7], 4294961152  ;;  %s2148_s17 = scalar_lea.vmem [#allocation8], %s1198_s29  ;;  %v291_v0 = vld [vmem:[%s2484_s2] sm:$0xff] (!%p2507_p4) }
  0x59   : > { %290 = sbr.rel (%p2507_p4) target bundleno = 96 (0x60), region = 52  ;;  %292 = vst [vmem:[#allocation2] sm:$0xff] (!%p2507_p4), %v291_v0 }
  0x60 PF: > { %v294_v1 = vld [vmem:[#allocation6 + $0x8] sm:$0xff]  ;;  %v297_v2 = vld [vmem:[#allocation6 + $0x20] sm:$0xff]  ;;  %v296_v5 = vld [vmem:[#allocation6 + $0x18] sm:$0xff]  ;;  %v1944_v8 = vmov 0.0|0.0   ;;  %v1945_v9 = vmov 0.0   ;;  %vm1946_vm0 = vmmov 0  }
  0x61   : > { %v293_v3 = vld [vmem:[#allocation6] sm:$0xff]  ;;  %v2155_v4 = vpack.c.bf16 %v297_v2, %v294_v1  ;;  %v300_v6 = vld [vmem:[#allocation6 + $0x38] sm:$0xff]  ;;  %v303_v7 = vld [vmem:[#allocation6 + $0x50] sm:$0xff]  ;;  %1471 = vmatprep.subr.bf16.mxu1 %v1944_v8  ;;  %418 = vmatprep.mubr.f32.mxu0 %v1945_v9  ;;  %v1947_v15 = vmov 0   ;;  %s2183_s27 = sshll.u32 %s2008_s25, 2  ;;  %p1222_p6 = scmp.ne.s32.totalorder %s2008_s25, 1 }
  0x62   : > { %v2159_v10 = vpack.c.bf16 %v296_v5, %v293_v3  ;;  %v2161_v11 = vpack.c.bf16 %v303_v7, %v300_v6  ;;  %v299_v12 = vld [vmem:[#allocation6 + $0x30] sm:$0xff]  ;;  %v302_v13 = vld [vmem:[#allocation6 + $0x48] sm:$0xff]  ;;  %1331 = vmatprep.mubr.msk.f32.mxu1 %vm1946_vm0, %v1945_v9  ;;  %1738 = vset.pattern.permute.xlu0 %v1947_v15  ;;  %v309_v16 = vld [vmem:[#allocation6 + $0x80] sm:$0xff]  ;;  %s694_s30 = sadd.s32 1, %s2183_s27  ;;  %v517_v43 = vstv %s2183_s27  ;;  %s873_s12 = sadd.s32 2, %s2183_s27 }
  0x63   : > { %v306_v14 = vld [vmem:[#allocation6 + $0x68] sm:$0xff]  ;;  %1440 = vmatprep.subr.bf16.mxu0 %v2155_v4  ;;  %1739 = vset.pattern.permute.xlu1 %v1947_v15  ;;  %v2169_v17 = vpack.c.bf16 %v302_v13, %v299_v12  ;;  %v305_v19 = vld [vmem:[#allocation6 + $0x60] sm:$0xff]  ;;  %v308_v20 = vld [vmem:[#allocation6 + $0x78] sm:$0xff]  ;;  %v695_v44 = vstv %s694_s30  ;;  %s1052_s7 = sadd.s32 3, %s2183_s27 }
  0x64   : > { %1442 = vmatpush1.bf16.msra.mxu0 %v2159_v10  ;;  %v2172_v18 = vpack.c.bf16 %v309_v16, %v306_v14  ;;  %v312_v21 = vld [vmem:[#allocation6 + $0x98] sm:$0xff]  ;;  %v315_v22 = vld [vmem:[#allocation6 + $0xb0] sm:$0xff]  ;;  %v2175_v23 = vpack.c.bf16 %v308_v20, %v305_v19  ;;  %v314_v26 = vld [vmem:[#allocation6 + $0xa8] sm:$0xff] }
  0x65   : > { %1444 = vmatprep.subr.bf16.mxu0 %v2161_v11  ;;  %v311_v24 = vld [vmem:[#allocation6 + $0x90] sm:$0xff]  ;;  %v2178_v25 = vpack.c.bf16 %v315_v22, %v312_v21  ;;  %v298_v28 = vld [vmem:[#allocation6 + $0x28] sm:$0xff]  ;;  %v321_v30 = vld [vmem:[#allocation6 + $0xe0] sm:$0xff] }
  0x66   : > { %v295_v27 = vld [vmem:[#allocation6 + $0x10] sm:$0xff]  ;;  %v318_v29 = vld [vmem:[#allocation6 + $0xc8] sm:$0xff]  ;;  %v301_v32 = vld [vmem:[#allocation6 + $0x40] sm:$0xff]  ;;  %v2187_v34 = vpack.c.bf16 %v314_v26, %v311_v24 }
  0x67   : > { %v2180_v31 = vpack.c.bf16 %v298_v28, %v295_v27  ;;  %v304_v33 = vld [vmem:[#allocation6 + $0x58] sm:$0xff]  ;;  %v317_v35 = vld [vmem:[#allocation6 + $0xc0] sm:$0xff]  ;;  %v2193_v37 = vpack.c.bf16 %v321_v30, %v318_v29  ;;  %v307_v39 = vld [vmem:[#allocation6 + $0x70] sm:$0xff] }
  0x68   : > { %1446 = vmatpush1.bf16.msra.mxu0 %v2169_v17  ;;  %v2190_v36 = vpack.c.bf16 %v304_v33, %v301_v32  ;;  %v320_v38 = vld [vmem:[#allocation6 + $0xd8] sm:$0xff]  ;;  %v310_v40 = vld [vmem:[#allocation6 + $0x88] sm:$0xff]  ;;  %v327_v42 = vld [vmem:[#allocation6 + $0x110] sm:$0xff] }
  0x69   : > { %1448 = vmatprep.subr.bf16.mxu0 %v2172_v18  ;;  %1473 = vmatpush3.bf16.msra.mxu1 %v2180_v31  ;;  %v324_v41 = vld [vmem:[#allocation6 + $0xf8] sm:$0xff]  ;;  %v2198_v45 = vpack.c.bf16 %v320_v38, %v317_v35  ;;  %v323_v46 = vld [vmem:[#allocation6 + $0xf0] sm:$0xff]  ;;  %v2201_v47 = vpack.c.bf16 %v310_v40, %v307_v39  ;;  %v326_v50 = vld [vmem:[#allocation6 + $0x108] sm:$0xff] }
  0x6a   : > { %1474 = vmatprep.subr.bf16.mxu1 %v1944_v8  ;;  %v2206_v48 = vld [vmem:[%s2483_s1] sm:$0xff]  ;;  %v2209_v49 = vpack.c.bf16 %v327_v42, %v324_v41  ;;  %v313_v51 = vld [vmem:[#allocation6 + $0xa0] sm:$0xff]  ;;  %v330_v53 = vld [vmem:[#allocation6 + $0x128] sm:$0xff]  ;;  %v2216_v56 = vpack.c.bf16 %v326_v50, %v323_v46 }
  0x6b   : > { %v316_v52 = vld [vmem:[#allocation6 + $0xb8] sm:$0xff]  ;;  %vm518_vm1 = vcmp.gt.s32.totalorder %v2206_v48, %v517_v43  ;;  %vm696_vm2 = vcmp.gt.s32.totalorder %v2206_v48, %v695_v44  ;;  %v333_v54 = vld [vmem:[#allocation6 + $0x140] sm:$0xff]  ;;  %v319_v62 = vld [vmem:[#allocation6 + $0xd0] sm:$0xff] }
  0x6c   : > { %1450 = vmatpush1.bf16.msra.mxu0 %v2175_v23  ;;  %v519_v55 = vsel %vm518_vm1, 1, %v1947_v15  ;;  %v329_v57 = vld [vmem:[#allocation6 + $0x120] sm:$0xff]  ;;  %v2219_v58 = vpack.c.bf16 %v316_v52, %v313_v51  ;;  %v697_v59 = vsel %vm696_vm2, 1, %v1947_v15  ;;  %v2223_v60 = vpack.c.bf16 %v333_v54, %v330_v53  ;;  %v332_v61 = vld [vmem:[#allocation6 + $0x138] sm:$0xff]  ;;  %v322_v63 = vld [vmem:[#allocation6 + $0xe8] sm:$0xff] }
  0x6d   : > { %1452 = vmatprep.subr.bf16.mxu0 %v2178_v25  ;;  %1476 = vmatpush3.bf16.msra.mxu1 %v2190_v36  ;;  %v336_v0 = vld [vmem:[#allocation6 + $0x158] sm:$0xff]  ;;  %v339_v1 = vld [vmem:[#allocation6 + $0x170] sm:$0xff]  ;;  %v2227_v2 = vpack.c.bf16 %v332_v61, %v329_v57  ;;  %v2230_v5 = vpack.c.bf16 %v322_v63, %v319_v62  ;;  %v338_v7 = vld [vmem:[#allocation6 + $0x168] sm:$0xff] }
  0x6e   : > { %1477 = vmatprep.subr.bf16.mxu1 %v1944_v8  ;;  %521 = vperm.xlu0 %1738, %v519_v55   ;;  %v335_v3 = vld [vmem:[#allocation6 + $0x150] sm:$0xff]  ;;  %v2233_v6 = vpack.c.bf16 %v339_v1, %v336_v0  ;;  %v325_v12 = vld [vmem:[#allocation6 + $0x100] sm:$0xff]  ;;  %v328_v13 = vld [vmem:[#allocation6 + $0x118] sm:$0xff] }
  0x6f   : > { %v2237_v14 = vpack.c.bf16 %v338_v7, %v335_v3  ;;  %v2240_v16 = vpack.c.bf16 %v328_v13, %v325_v12  ;;  %v331_v19 = vld [vmem:[#allocation6 + $0x130] sm:$0xff]  ;;  %v334_v20 = vld [vmem:[#allocation6 + $0x148] sm:$0xff]  ;;  %v2245_v21 = vld [vmem:[#allocation2] sm:$0xff]  ;;  %v874_v12 = vstv %s873_s12  ;;  %v1053_v13 = vstv %s1052_s7 }
  0x70   : > { %1454 = vmatpush1.bf16.msra.mxu0 %v2187_v34  ;;  %v2248_v22 = vpack.c.bf16 %v334_v20, %v331_v19  ;;  %v337_v24 = vld [vmem:[#allocation6 + $0x160] sm:$0xff]  ;;  %v340_v26 = vld [vmem:[#allocation6 + $0x178] sm:$0xff]  ;;  %v352_v32 = vld [vmem:[%s2137_s8 + $0x8] sm:$0xff]  ;;  %vm875_vm4 = vcmp.gt.s32.totalorder %v2206_v48, %v874_v12  ;;  %vm1054_vm5 = vcmp.gt.s32.totalorder %v2206_v48, %v1053_v13 }
  0x71   : > { %1456 = vmatprep.subr.bf16.mxu0 %v2193_v37  ;;  %1479 = vmatpush3.bf16.msra.mxu1 %v2201_v47  ;;  %v2254_v27 = vpack.c.bf16 %v340_v26, %v337_v24  ;;  %v351_v28 = vld [vmem:[%s2137_s8] sm:$0xff]  ;;  %v2300_v46 = vld [vmem:[%s2486_s4] ss:$0 sm:$0xff]  ;;  %v353_v53 = vld [vmem:[%s2137_s8 + $0x10] sm:$0xff]  ;;  %v876_v19 = vsel %vm875_vm4, 1, %v1947_v15  ;;  %v1055_v20 = vsel %vm1054_vm5, 1, %v1947_v15 }
  0x72   : > { %1480 = vmatprep.subr.bf16.mxu1 %v1944_v8  ;;  %699 = vperm.xlu0 %1738, %v697_v59   ;;  %v1217_v13 = vld [vmem:[%s2137_s8 + $0x50] sm:$0xff] }
  0x73   : > { %878 = vperm.xlu1 %1739, %v876_v19  }
  0x74   : > { %1458 = vmatpush1.bf16.msra.mxu0 %v2198_v45 }
  0x75   : > { %1460 = vmatprep.subr.bf16.mxu0 %v2209_v49  ;;  %1482 = vmatpush3.bf16.msra.mxu1 %v2219_v58 }
  0x76   : > { %1483 = vmatprep.subr.bf16.mxu1 %v1944_v8 }
  0x77   : > { %1057 = vperm.xlu1 %1739, %v1055_v20  }
  0x78   : > { %1462 = vmatpush1.bf16.msra.mxu0 %v2216_v56 }
  0x79   : > { %1464 = vmatprep.subr.bf16.mxu0 %v2223_v60  ;;  %1485 = vmatpush3.bf16.msra.mxu1 %v2230_v5 }
  0x7a   : > { %1486 = vmatprep.subr.bf16.mxu1 %v1944_v8 }
  0x7c   : > { %1466 = vmatpush1.bf16.msra.mxu0 %v2227_v2 }
  0x7d   : > { %1468 = vmatprep.subr.bf16.mxu0 %v2233_v6  ;;  %1488 = vmatpush3.bf16.msra.mxu1 %v2240_v16 }
  0x7e   : > { %1489 = vmatprep.subr.bf16.mxu1 %v1944_v8 }
  0x80   : > { %1470 = vmatpush1.bf16.msra.mxu0 %v2237_v14 }
  0x81   : > { %1496 = vmatprep.subr.bf16.mxu0 %v2155_v4  ;;  %1491 = vmatpush3.bf16.msra.mxu1 %v2248_v22 }
  0x82   : > { %1492 = vmatprep.subr.bf16.mxu1 %v1944_v8 }
  0x83   : > { %419 = vmatmul.mubr.f32.vlgmr.msra.gmra.mrb[0].mxu0 %v2245_v21 }
  0x84   : > { %1498 = vmatpush1.bf16.msra.mxu0 %v2159_v10  ;;  %595 = vmatprep.mubr.f32.mxu0 %v1945_v9 }
  0x85   : > { %1500 = vmatprep.subr.bf16.mxu0 %v2161_v11  ;;  %1494 = vmatpush3.bf16.msra.mxu1 %v2254_v27 }
  0x86   : > { %1527 = vmatprep.subr.bf16.mxu1 %v1944_v8 }
  0x88   : > { %1502 = vmatpush1.bf16.msra.mxu0 %v2169_v17  ;;  %1332 = vmatmul.mubr.f32.vlgmr.msra.gmra.mrb[0].mxu1 %v2245_v21 }
  0x89   : > { %1504 = vmatprep.subr.bf16.mxu0 %v2172_v18  ;;  %1529 = vmatpush3.bf16.msra.mxu1 %v2180_v31 }
  0x8a   : > { %1530 = vmatprep.subr.bf16.mxu1 %v1944_v8  ;;  %1366 = vmatprep.mubr.msk.f32.mxu1 %vm1946_vm0, %v1945_v9 }
  0x8c   : > { %1506 = vmatpush1.bf16.msra.mxu0 %v2175_v23 }
  0x8d   : > { %1508 = vmatprep.subr.bf16.mxu0 %v2178_v25  ;;  %1532 = vmatpush3.bf16.msra.mxu1 %v2190_v36 }
  0x8e   : > { %1533 = vmatprep.subr.bf16.mxu1 %v1944_v8 }
  0x90   : > { %1510 = vmatpush1.bf16.msra.mxu0 %v2187_v34 }
  0x91   : > { %1512 = vmatprep.subr.bf16.mxu0 %v2193_v37  ;;  %1535 = vmatpush3.bf16.msra.mxu1 %v2201_v47 }
  0x92   : > { %1536 = vmatprep.subr.bf16.mxu1 %v1944_v8 }
  0x94   : > { %1514 = vmatpush1.bf16.msra.mxu0 %v2198_v45 }
  0x95   : > { %1516 = vmatprep.subr.bf16.mxu0 %v2209_v49  ;;  %1538 = vmatpush3.bf16.msra.mxu1 %v2219_v58 }
  0x96   : > { %1539 = vmatprep.subr.bf16.mxu1 %v1944_v8 }
  0x98   : > { %1518 = vmatpush1.bf16.msra.mxu0 %v2216_v56 }
  0x99   : > { %1520 = vmatprep.subr.bf16.mxu0 %v2223_v60  ;;  %1541 = vmatpush3.bf16.msra.mxu1 %v2230_v5 }
  0x9a   : > { %1542 = vmatprep.subr.bf16.mxu1 %v1944_v8 }
  0x9c   : > { %1522 = vmatpush1.bf16.msra.mxu0 %v2227_v2 }
  0x9d   : > { %1524 = vmatprep.subr.bf16.mxu0 %v2233_v6  ;;  %1544 = vmatpush3.bf16.msra.mxu1 %v2240_v16 }
  0x9e   : > { %1545 = vmatprep.subr.bf16.mxu1 %v1944_v8 }
  0xa0   : > { %1526 = vmatpush1.bf16.msra.mxu0 %v2237_v14 }
  0xa1   : > { %1552 = vmatprep.subr.bf16.mxu0 %v2155_v4  ;;  %1547 = vmatpush3.bf16.msra.mxu1 %v2248_v22 }
  0xa2   : > { %1548 = vmatprep.subr.bf16.mxu1 %v1944_v8 }
  0xa5   : > { %1550 = vmatpush3.bf16.msra.mxu1 %v2254_v27 }
  0xa6   : > { %1583 = vmatprep.subr.bf16.mxu1 %v1944_v8 }
  0xed   : > { %v522_v62 = vpop.permute.xlu0 %521 }
  0xee   : > { %vm523_vm3 = vcmp.eq.s32.totalorder %v522_v62, 1 }
 0x156   : > { %v420_v29 = vpop.f32.mrb[0].mxu0 }
 0x157   : > { %v495_v30 = vadd.f32 %v420_v29, %v351_v28  ;;  %v422_v33 = vpop.f32.mrb[1].mxu0  ;;  %v1205_v28 = vld [vmem:[%s2137_s8 + $0x20] sm:$0xff] }
 0x158   : > { %v502_v38 = vadd.f32 %v422_v33, %v352_v32 }
 0x159   : > { %v1202_v35 = vmul.f32 -1.442695, %v495_v30 }
 0x15a   : > { %v1203_v39 = vmul.f32 -1.442695, %v502_v38 }
 0x15b   : > { %1740 = vpow2.f32 %v1202_v35  ;;  %v491_v40 = vpop.f32.mrb[0].mxu1 }
 0x15c   : > { %v1333_v41 = vpop.f32.mrb[1].mxu1  ;;  %1742 = vpow2.f32 %v1203_v39  ;;  %v509_v51 = vadd.f32 %v2300_v46, %v491_v40 }
 0x165   : > { %v1741_v42 = vpop.eup %1740 }
 0x166   : > { %v499_v43 = vadd.f32 1.0, %v1741_v42  ;;  %v1743_v44 = vpop.eup %1742  ;;  %v1206_v42 = vld [vmem:[%s2137_s8 + $0x28] sm:$0xff] }
 0x167   : > { %v506_v50 = vadd.f32 1.0, %v1743_v44 }
 0x168   : > { %1744 = vrcp.f32 %v499_v43 }
 0x169   : > { %1746 = vrcp.f32 %v506_v50 }
 0x172   : > { %v1745_v52 = vpop.eup %1744 }
 0x173   : > { %v510_v54 = vmul.f32 %v1745_v52, %v509_v51  ;;  %v1747_v57 = vpop.eup %1746 }
 0x174   : > { %v513_v59 = vsub.f32 1.0, %v1747_v57  ;;  %v515_v0 = vmul.f32 %v1747_v57, %v2245_v21 }
 0x175   : > { %v511_v55 = vadd.f32 %v510_v54, %v353_v53  ;;  %v700_v53 = vpop.permute.xlu0 %699 }
 0x176   : > { %vm701_vm6 = vcmp.eq.s32.totalorder %v700_v53, 1 }
 0x177   : > { %1748 = vtanh.f32 %v511_v55 }
 0x181   : > { %v1749_v61 = vpop.eup %1748 }
 0x182   : > { %v514_v63 = vmul.f32 %v1749_v61, %v513_v59 }
 0x184   : > { %v516_v1 = vadd.f32 %v515_v0, %v514_v63 }
 0x186   : > { %v2306_v3 = vsel %vm523_vm3, %v516_v1, %v2245_v21  ;;  %v525_v7 = vsel %vm523_vm3, %v516_v1, 0.0  ;;  %v1204_v21 = vld [vmem:[%s2137_s8 + $0x18] sm:$0xff]  ;;  %v1216_v1 = vld [vmem:[%s2137_s8 + $0x48] sm:$0xff] }
 0x187   : > { %526 = vst [vmem:[%s2148_s17] sm:$0xff] %v525_v7  ;;  %596 = vmatmul.mubr.f32.vlgmr.msra.gmra.mrb[2].mxu0 %v2306_v3  ;;  %1367 = vmatmul.mubr.f32.vlgmr.msra.gmra.mrb[2].mxu1 %v2306_v3 }
 0x188   : > { %1554 = vmatpush1.bf16.msra.mxu0 %v2159_v10  ;;  %1585 = vmatpush3.bf16.msra.mxu1 %v2180_v31 }
 0x189   : > { %1556 = vmatprep.subr.bf16.mxu0 %v2161_v11  ;;  %1586 = vmatprep.subr.bf16.mxu1 %v1944_v8 }
 0x18a   : > { %774 = vmatprep.mubr.f32.mxu0 %v1945_v9  ;;  %1401 = vmatprep.mubr.msk.f32.mxu1 %vm1946_vm0, %v1945_v9 }
 0x18c   : > { %1558 = vmatpush1.bf16.msra.mxu0 %v2169_v17  ;;  %1588 = vmatpush3.bf16.msra.mxu1 %v2190_v36 }
 0x18d   : > { %1560 = vmatprep.subr.bf16.mxu0 %v2172_v18  ;;  %1589 = vmatprep.subr.bf16.mxu1 %v1944_v8 }
 0x190   : > { %1562 = vmatpush1.bf16.msra.mxu0 %v2175_v23  ;;  %1591 = vmatpush3.bf16.msra.mxu1 %v2201_v47 }
 0x191   : > { %1564 = vmatprep.subr.bf16.mxu0 %v2178_v25  ;;  %1592 = vmatprep.subr.bf16.mxu1 %v1944_v8 }
 0x194   : > { %1566 = vmatpush1.bf16.msra.mxu0 %v2187_v34  ;;  %1594 = vmatpush3.bf16.msra.mxu1 %v2219_v58 }
 0x195   : > { %1568 = vmatprep.subr.bf16.mxu0 %v2193_v37  ;;  %1595 = vmatprep.subr.bf16.mxu1 %v1944_v8 }
 0x198   : > { %1570 = vmatpush1.bf16.msra.mxu0 %v2198_v45  ;;  %1597 = vmatpush3.bf16.msra.mxu1 %v2230_v5 }
 0x199   : > { %1572 = vmatprep.subr.bf16.mxu0 %v2209_v49  ;;  %1598 = vmatprep.subr.bf16.mxu1 %v1944_v8 }
 0x19c   : > { %1574 = vmatpush1.bf16.msra.mxu0 %v2216_v56  ;;  %1600 = vmatpush3.bf16.msra.mxu1 %v2240_v16 }
 0x19d   : > { %1576 = vmatprep.subr.bf16.mxu0 %v2223_v60  ;;  %1601 = vmatprep.subr.bf16.mxu1 %v1944_v8 }
 0x1a0   : > { %1578 = vmatpush1.bf16.msra.mxu0 %v2227_v2  ;;  %1603 = vmatpush3.bf16.msra.mxu1 %v2248_v22 }
 0x1a1   : > { %1580 = vmatprep.subr.bf16.mxu0 %v2233_v6  ;;  %1604 = vmatprep.subr.bf16.mxu1 %v1944_v8 }
 0x1a4   : > { %1582 = vmatpush1.bf16.msra.mxu0 %v2237_v14  ;;  %1606 = vmatpush3.bf16.msra.mxu1 %v2254_v27 }
 0x1a5   : > { %1608 = vmatprep.subr.bf16.mxu0 %v2155_v4  ;;  %1639 = vmatprep.subr.bf16.mxu1 %v1944_v8 }
 0x25a   : > { %v597_v24 = vpop.f32.mrb[2].mxu0  ;;  %v668_v4 = vpop.f32.mrb[2].mxu1 }
 0x25b   : > { %v672_v26 = vadd.f32 %v1204_v21, %v597_v24  ;;  %v599_v29 = vpop.f32.mrb[3].mxu0  ;;  %v1368_v30 = vpop.f32.mrb[3].mxu1  ;;  %v686_v15 = vadd.f32 %v2300_v46, %v668_v4 }
 0x25c   : > { %v679_v33 = vadd.f32 %v1205_v28, %v599_v29 }
 0x25d   : > { %v1207_v32 = vmul.f32 -1.442695, %v672_v26 }
 0x25e   : > { %v1208_v35 = vmul.f32 -1.442695, %v679_v33 }
 0x25f   : > { %1750 = vpow2.f32 %v1207_v32 }
 0x260   : > { %1752 = vpow2.f32 %v1208_v35  ;;  %v1218_v35 = vld [vmem:[%s2137_s8 + $0x58] sm:$0xff] }
 0x269   : > { %v1751_v48 = vpop.eup %1750 }
 0x26a   : > { %v676_v38 = vadd.f32 1.0, %v1751_v48  ;;  %v1753_v39 = vpop.eup %1752 }
 0x26b   : > { %v683_v40 = vadd.f32 1.0, %v1753_v39 }
 0x26c   : > { %1754 = vrcp.f32 %v676_v38 }
 0x26d   : > { %1756 = vrcp.f32 %v683_v40 }
 0x276   : > { %v1755_v41 = vpop.eup %1754 }
 0x277   : > { %v687_v43 = vmul.f32 %v1755_v41, %v686_v15  ;;  %v1757_v50 = vpop.eup %1756 }
 0x278   : > { %v690_v51 = vsub.f32 1.0, %v1757_v50  ;;  %v692_v55 = vmul.f32 %v1757_v50, %v2306_v3 }
 0x279   : > { %v688_v44 = vadd.f32 %v1206_v42, %v687_v43 }
 0x27b   : > { %1758 = vtanh.f32 %v688_v44 }
 0x285   : > { %v1759_v52 = vpop.eup %1758 }
 0x286   : > { %v691_v54 = vmul.f32 %v1759_v52, %v690_v51 }
 0x288   : > { %v693_v57 = vadd.f32 %v692_v55, %v691_v54 }
 0x28a   : > { %v2358_v59 = vsel %vm701_vm6, %v693_v57, %v2306_v3  ;;  %v703_v61 = vsel %vm701_vm6, %v693_v57, 0.0 }
 0x28b   : > { %1209 = vst [vmem:[%s2148_s17 + $0x8] sm:$0xff] %v703_v61  ;;  %775 = vmatmul.mubr.f32.vlgmr.msra.gmra.mrb[4].mxu0 %v2358_v59  ;;  %1402 = vmatmul.mubr.f32.vlgmr.msra.gmra.mrb[4].mxu1 %v2358_v59 }
 0x28c   : > { %1610 = vmatpush1.bf16.msra.mxu0 %v2159_v10  ;;  %1641 = vmatpush3.bf16.msra.mxu1 %v2180_v31 }
 0x28d   : > { %1612 = vmatprep.subr.bf16.mxu0 %v2161_v11  ;;  %1642 = vmatprep.subr.bf16.mxu1 %v1944_v8 }
 0x28e   : > { %953 = vmatprep.mubr.f32.mxu0 %v1945_v9  ;;  %1436 = vmatprep.mubr.msk.f32.mxu1 %vm1946_vm0, %v1945_v9  ;;  %v1210_v9 = vld [vmem:[%s2137_s8 + $0x30] sm:$0xff] }
 0x290   : > { %1614 = vmatpush1.bf16.msra.mxu0 %v2169_v17  ;;  %1644 = vmatpush3.bf16.msra.mxu1 %v2190_v36 }
 0x291   : > { %1616 = vmatprep.subr.bf16.mxu0 %v2172_v18  ;;  %1645 = vmatprep.subr.bf16.mxu1 %v1944_v8  ;;  %v1211_v18 = vld [vmem:[%s2137_s8 + $0x38] sm:$0xff] }
 0x294   : > { %1618 = vmatpush1.bf16.msra.mxu0 %v2175_v23  ;;  %1647 = vmatpush3.bf16.msra.mxu1 %v2201_v47 }
 0x295   : > { %1620 = vmatprep.subr.bf16.mxu0 %v2178_v25  ;;  %1648 = vmatprep.subr.bf16.mxu1 %v1944_v8 }
 0x298   : > { %1622 = vmatpush1.bf16.msra.mxu0 %v2187_v34  ;;  %1650 = vmatpush3.bf16.msra.mxu1 %v2219_v58  ;;  %v1212_v58 = vld [vmem:[%s2137_s8 + $0x40] sm:$0xff] }
 0x299   : > { %1624 = vmatprep.subr.bf16.mxu0 %v2193_v37  ;;  %1651 = vmatprep.subr.bf16.mxu1 %v1944_v8 }
 0x29c   : > { %1626 = vmatpush1.bf16.msra.mxu0 %v2198_v45  ;;  %1653 = vmatpush3.bf16.msra.mxu1 %v2230_v5 }
 0x29d   : > { %1628 = vmatprep.subr.bf16.mxu0 %v2209_v49  ;;  %1654 = vmatprep.subr.bf16.mxu1 %v1944_v8 }
 0x2a0   : > { %1630 = vmatpush1.bf16.msra.mxu0 %v2216_v56  ;;  %1656 = vmatpush3.bf16.msra.mxu1 %v2240_v16  ;;  %v879_v16 = vpop.permute.xlu1 %878 }
 0x2a1   : > { %1632 = vmatprep.subr.bf16.mxu0 %v2223_v60  ;;  %1657 = vmatprep.subr.bf16.mxu1 %v1944_v8  ;;  %vm880_vm7 = vcmp.eq.s32.totalorder %v879_v16, 1 }
 0x2a4   : > { %1634 = vmatpush1.bf16.msra.mxu0 %v2227_v2  ;;  %1659 = vmatpush3.bf16.msra.mxu1 %v2248_v22  ;;  %v1058_v41 = vpop.permute.xlu1 %1057 }
 0x2a5   : > { %1636 = vmatprep.subr.bf16.mxu0 %v2233_v6  ;;  %1660 = vmatprep.subr.bf16.mxu1 %v1944_v8  ;;  %vm1059_vm8 = vcmp.eq.s32.totalorder %v1058_v41, 1 }
 0x2a8   : > { %1638 = vmatpush1.bf16.msra.mxu0 %v2237_v14  ;;  %1662 = vmatpush3.bf16.msra.mxu1 %v2254_v27 }
 0x35e   : > { %v776_v10 = vpop.f32.mrb[4].mxu0  ;;  %v847_v11 = vpop.f32.mrb[4].mxu1 }
 0x35f   : > { %v851_v17 = vadd.f32 %v1210_v9, %v776_v10  ;;  %v778_v23 = vpop.f32.mrb[5].mxu0  ;;  %v1403_v25 = vpop.f32.mrb[5].mxu1  ;;  %v865_v49 = vadd.f32 %v2300_v46, %v847_v11 }
 0x360   : > { %v858_v34 = vadd.f32 %v1211_v18, %v778_v23 }
 0x361   : > { %v1213_v31 = vmul.f32 -1.442695, %v851_v17 }
 0x362   : > { %v1214_v36 = vmul.f32 -1.442695, %v858_v34 }
 0x363   : > { %1760 = vpow2.f32 %v1213_v31 }
 0x364   : > { %1762 = vpow2.f32 %v1214_v36 }
 0x36d   : > { %v1761_v37 = vpop.eup %1760 }
 0x36e   : > { %v855_v45 = vadd.f32 1.0, %v1761_v37  ;;  %v1763_v8 = vpop.eup %1762 }
 0x36f   : > { %v862_v47 = vadd.f32 1.0, %v1763_v8 }
 0x370   : > { %1764 = vrcp.f32 %v855_v45 }
 0x371   : > { %1766 = vrcp.f32 %v862_v47 }
 0x37a   : > { %v1765_v56 = vpop.eup %1764 }
 0x37b   : > { %v866_v60 = vmul.f32 %v1765_v56, %v865_v49  ;;  %v1767_v5 = vpop.eup %1766 }
 0x37c   : > { %v869_v6 = vsub.f32 1.0, %v1767_v5  ;;  %v871_v27 = vmul.f32 %v1767_v5, %v2358_v59 }
 0x37d   : > { %v867_v2 = vadd.f32 %v1212_v58, %v866_v60 }
 0x37f   : > { %1768 = vtanh.f32 %v867_v2 }
 0x389   : > { %v1769_v14 = vpop.eup %1768 }
 0x38a   : > { %v870_v22 = vmul.f32 %v1769_v14, %v869_v6 }
 0x38c   : > { %v872_v62 = vadd.f32 %v871_v27, %v870_v22 }
 0x38e   : > { %v881_v63 = vsel %vm880_vm7, %v872_v62, %v2358_v59  ;;  %v882_v0 = vsel %vm880_vm7, %v872_v62, 0.0 }
 0x38f   : > { %1215 = vst [vmem:[%s2148_s17 + $0x10] sm:$0xff] %v882_v0  ;;  %954 = vmatmul.mubr.f32.vlgmr.msra.gmra.mrb[6].mxu0 %v881_v63  ;;  %1437 = vmatmul.mubr.f32.vlgmr.msra.gmra.mrb[6].mxu1 %v881_v63 }
 0x462   : > { %v955_v3 = vpop.f32.mrb[6].mxu0  ;;  %v1026_v7 = vpop.f32.mrb[6].mxu1 }
 0x463   : > { %v1030_v12 = vadd.f32 %v1216_v1, %v955_v3  ;;  %v957_v19 = vpop.f32.mrb[7].mxu0  ;;  %v1438_v20 = vpop.f32.mrb[7].mxu1  ;;  %v1044_v32 = vadd.f32 %v2300_v46, %v1026_v7 }
 0x464   : > { %v1037_v24 = vadd.f32 %v1217_v13, %v957_v19 }
 0x465   : > { %v1219_v21 = vmul.f32 -1.442695, %v1030_v12 }
 0x466   : > { %v1220_v4 = vmul.f32 -1.442695, %v1037_v24 }
 0x467   : > { %1770 = vpow2.f32 %v1219_v21 }
 0x468   : > { %1772 = vpow2.f32 %v1220_v4 }
 0x471   : > { %v1771_v26 = vpop.eup %1770 }
 0x472   : > { %v1034_v28 = vadd.f32 1.0, %v1771_v26  ;;  %v1773_v29 = vpop.eup %1772 }
 0x473   : > { %v1041_v30 = vadd.f32 1.0, %v1773_v29 }
 0x474   : > { %1774 = vrcp.f32 %v1034_v28 }
 0x475   : > { %1776 = vrcp.f32 %v1041_v30 }
 0x47e   : > { %v1775_v33 = vpop.eup %1774 }
 0x47f   : > { %v1045_v48 = vmul.f32 %v1775_v33, %v1044_v32  ;;  %v1777_v39 = vpop.eup %1776 }
 0x480   : > { %v1048_v40 = vsub.f32 1.0, %v1777_v39  ;;  %v1050_v43 = vmul.f32 %v1777_v39, %v881_v63 }
 0x481   : > { %v1046_v38 = vadd.f32 %v1218_v35, %v1045_v48 }
 0x483   : > { %1778 = vtanh.f32 %v1046_v38 }
 0x48d   : > { %v1779_v15 = vpop.eup %1778  ;;  %1068 = sbr.rel (%p1222_p6) target bundleno = 1173 (0x495), region = 56 }
 0x48e   : > { %v1049_v42 = vmul.f32 %v1779_v15, %v1048_v40 }
 0x490   : > { %v1051_v44 = vadd.f32 %v1050_v43, %v1049_v42 }
 0x492   : > { %v1060_v50 = vsel %vm1059_vm8, %v1051_v44, %v881_v63  ;;  %v1061_v51 = vsel %vm1059_vm8, %v1051_v44, 0.0 }
 0x493   : > { %1221 = vst [vmem:[%s2148_s17 + $0x18] sm:$0xff] %v1061_v51  ;;  %1064 = vst [vmem:[#allocation2] sm:$0xff] %v1060_v50 }
 0x494   : > { %1069 = vst [vmem:[#allocation9] sm:$0xff] %v1060_v50 }
 0x495 PF: > { %s1230_s11 = sshll.u32 %s2008_s25, 9  ;;  %s1084_s19 = sshll.u32 %s2148_s17, 4  ;;  %s2416_s19 = int_to_ptr.vmem [resolvable:$true] %s1084_s19 }
 0x496   : > { %s2413_s10 = scalar_lea.hbm %s2487_s5, %s1230_s11  ;;  %s1071_s27 = scalar_lea.sflag [#allocation5], %s2133_s15 }
 0x497   : > { %s1838_s30 = scalar_lea.vmem %s2416_s19, 512  ;;  %s1948_s16 = smov [#allocation8]  }
 0x498   : > { %p1839_p8 = scmp.ne.s32.totalorder %s2416_s19, %s1838_s30  ;;  %s1842_s18 = sshll.u32 %s1948_s16, 4  ;;  %s1843_s18 = int_to_ptr.vmem [resolvable:$false] %s1842_s18 }
 0x499   : > { %s1844_s20 = scalar_lea.vmem %s1843_s18, 1024  ;;  %p1845_p3 = scmp.lt.s32.totalorder %s2416_s19, %s1843_s18 }
 0x49a   : > { %p1840_p9 = pnand %p1839_p8, %p2082_p11  ;;  %p1846_p7 = scmp.lt.s32.totalorder %s1844_s20, %s1838_s30 }
 0x49c   : > { %p1841_p12 = pneg %p1840_p9  ;;  %p1847_p10 = por %p1846_p7, %p1845_p3 }
 0x49e   : > { %p1848_p1 = pnand %p1847_p10, %p1841_p12 }
 0x4a0   : > { %1851 = shalt.err (!%p1848_p1)
}
 0x4a1   : > { %s1852_s17 = scalar_lea.hbm %s2413_s10, 512  ;;  %s1856_s7 = scalar_lea.hbm %s2487_s5, 1024 }
 0x4a2   : > { %p1853_p0 = scmp.ne.s32.totalorder %s2413_s10, %s1852_s17  ;;  %p1857_p2 = scmp.lt.u32.totalorder %s2413_s10, %s2487_s5 }
 0x4a3   : > { %p1858_p4 = scmp.lt.u32.totalorder %s1856_s7, %s1852_s17  ;;  %p1860_p8 = scmp.lt.u32.totalorder %s1852_s17, %s2413_s10 }
 0x4a4   : > { %p1854_p5 = pnand %p1853_p0, %p2082_p11 }
 0x4a5   : > { %p1859_p6 = por %p1858_p4, %p1857_p2 }
 0x4a6   : > { %p1855_p13 = pneg %p1854_p5 }
 0x4a7   : > { %p1861_p9 = por %p1860_p8, %p1859_p6 }
 0x4a9   : > { %p1862_p12 = pnand %p1861_p9, %p1855_p13 }
 0x4ab   : > { %1865 = shalt.err (!%p1862_p12)
}
 0x4ac   : > { %s1949_s29 = smov 128   ;;  %s1950_s30 = smov 8  }
 0x4ad   : > { %1672 = dma.vmem_to_hbm [thread:$0]  (%p2082_p11), %s2416_s19, 512, %s2413_s10, %s1071_s27, %s1949_s29, %s1949_s29, %s1950_s30  }
 0x4ae   : > { %s1951_s16 = smov [#allocation9]   ;;  %p2508_p7 = scmp.eq.s32.totalorder %s2008_s25, 1 }
 0x4af   : > { %s1098_s18 = sshll.u32 %s1951_s16, 4  ;;  %s1099_s18 = int_to_ptr.vmem [resolvable:$true] %s1098_s18 }
 0x4b0   : > { %s1866_s20 = scalar_lea.vmem %s1099_s18, 128  ;;  %p1873_p0 = scmp.lt.s32.totalorder %s1099_s18, %s1099_s18 }
 0x4b1   : > { %p1867_p3 = scmp.ne.s32.totalorder %s1099_s18, %s1866_s20  ;;  %p1874_p5 = scmp.lt.s32.totalorder %s1866_s20, %s1866_s20 }
 0x4b3   : > { %p1868_p10 = pnand %p1867_p3, %p2508_p7  ;;  %p1875_p13 = por %p1874_p5, %p1873_p0 }
 0x4b5   : > { %p1869_p1 = pneg %p1868_p10 }
 0x4b7   : > { %p1876_p2 = pnand %p1875_p13, %p1869_p1 }
 0x4b9   : > { %1879 = shalt.err (!%p1876_p2)
}
 0x4ba   : > { %s1880_s14 = scalar_lea.hbm %s2488_s6, 128  ;;  %p2509_p4 = pmov %p2508_p7 }
 0x4bb   : > { %p1881_p11 = scmp.ne.s32.totalorder %s2488_s6, %s1880_s14  ;;  %p1886_p9 = scmp.lt.u32.totalorder %s1880_s14, %s2488_s6 }
 0x4bd   : > { %p1882_p6 = pnand %p1881_p11, %p2509_p4 }
 0x4bf   : > { %p1883_p8 = pneg %p1882_p6 }
 0x4c1   : > { %p1888_p12 = pnand %p1886_p9, %p1883_p8 }
 0x4c3   : > { %1891 = shalt.err (!%p1888_p12)
}
 0x4c4   : > { %p2510_p3 = pmov %p2509_p4 }
 0x4c6   : > { %1674 = dma.vmem_to_hbm [thread:$0]  (%p2510_p3), %s1099_s18, 128, %s2488_s6, [#allocation10]  }
 0x4c7   : > { %p2511_p7 = pmov %p2510_p3 }
 0x4c8   : > { %p2512_p10 = pmov %p2510_p3 }
 0x4c9   : > { %1917 = dma.done.wait (%p2511_p7), [#allocation10], 128  }
 0x4ca   : > { %1919 = vsyncadd (%p2512_p10), [#allocation10], 4294967168 }
 0x4cb PF: > { %s1114_s11 = sand.u32 1, %s1926_s21   ;;  %p2513_p1 = scmp.ne.s32.totalorder %s2495_s28, 0 }
 0x4cc   : > { %p2514_p0 = scmp.ge.s32.totalorder %s1938_s24, 2  ;;  %s1115_s8 = scalar_lea.sflag [#allocation5], %s1114_s11 }
 0x4ce   : > { %p1687_p5 = pnand %p2514_p0, %p2513_p1 }
 0x4d0   : > { %1921 = dma.done.wait (!%p1687_p5), %s1115_s8, 512  }
 0x4d1   : > { %1923 = vsyncadd (!%p1687_p5), %s1115_s8, 4294966784  ;;  %p22_p13 = scmp.ge.s32.totalorder %s2044_s9, 4   ;;  %s2515_s21 = smov %s1930_s22 }
 0x4d2   : > { %s2516_s22 = smov %s1934_s23  ;;  %s2517_s23 = smov %s2078_s13 }
 0x4d3   : > { %s2518_s24 = smov %s2044_s9  ;;  %24 = sbr.rel (!%p22_p13) target bundleno = 7 (0x7), region = 111 }
 0x4da   :  { %1120 = vsyncpa [#allocation4], 1 }
 0x4db   :  { %1122 = vsyncpa [#allocation4 + $0x1], 1 }
 0x4dc   :  { %1123 = vsyncpa [#allocation7], 1 }
 0x4dd   :  { %1124 = vsyncpa [#allocation5], 1 }
 0x4de   :  { %1126 = vsyncpa [#allocation5 + $0x1], 1 }
 0x4df   :  { %1127 = vsyncpa [#allocation10], 1 }

</bundles_post_ra>
